<compile_context>
chip_gen: v7x
topology: tpu7x:2x2x1
jax: 0.10.0
libtpu: 0.0.40
codegen_flags: <defaults>
</compile_context>

<pallas_src>
from functools import partial

import numpy as np
import jax
import jax.numpy as jnp
from jax import lax
from jax.experimental import pallas as pl
from jax.experimental.pallas import tpu as pltpu

# ---------------- model hyper-parameters (small, synthetic) ----------------
IN_DIM = 8
OUT_DIM = 4
HIDDEN_DIMS = [32, 32]
NUM_HEADS = 4
BATCH = 2           # batch_size argument of forward()
N_CTX = 8           # n_context  -> x has shape (BATCH * N_CTX, IN_DIM)
OUT_PAD = 128       # lane-dense padded width for the final linear output

_VMEM = pl.BlockSpec(memory_space=pltpu.MemorySpace.VMEM)


# ------------------------------ fused kernel --------------------------------
def _fused_kernel(*refs, num_hidden, num_heads):
    """Entire forward pass for all B*S rows in one invocation.

    refs = [x, mask,
            w_h0, b_h0, ..., w_h{num_hidden-1}, b_h{num_hidden-1},
            w_attn(4,D,D), b_attn(4,1,D), w_out(D,OUT_PAD), b_out(1,OUT_PAD),
            o_ref(N,OUT_PAD), cat_scratch(N,D)]
    """
    x_ref, mask_ref = refs[0], refs[1]
    hidden_refs = refs[2:2 + 2 * num_hidden]
    wattn_ref, battn_ref, wout_ref, bout_ref = refs[2 + 2 * num_hidden:
                                                    6 + 2 * num_hidden]
    o_ref = refs[6 + 2 * num_hidden]
    cat_ref = refs[7 + 2 * num_hidden]

    # ---- hidden MLP layers (Linear + relu), all in VMEM ----
    h = x_ref[...]
    for i in range(num_hidden):
        w = hidden_refs[2 * i][...]
        b = hidden_refs[2 * i + 1][...]
        h = jnp.maximum(
            jnp.dot(h, w, preferred_element_type=jnp.float32) + b, 0.0)

    d = h.shape[-1]
    hd = d // num_heads
    scale = 1.0 / float(np.sqrt(hd))

    # ---- multi-head self-attention ----
    wq, wk, wv, wo = wattn_ref[0], wattn_ref[1], wattn_ref[2], wattn_ref[3]
    bq, bk, bv, bo = battn_ref[0], battn_ref[1], battn_ref[2], battn_ref[3]
    q = jnp.dot(h, wq, preferred_element_type=jnp.float32) + bq   # (N, D)
    k = jnp.dot(h, wk, preferred_element_type=jnp.float32) + bk
    v = jnp.dot(h, wv, preferred_element_type=jnp.float32) + bv

    mask = mask_ref[...]               # (N, N): 0 within batch elem, -1e30 across
    dn = (((1,), (1,)), ((), ()))      # contract shared last dim -> q @ k^T, no vxpose

    for hh in range(num_heads):        # static, fully unrolled
        lo = hh * hd
        qh = q[:, lo:lo + hd]
        kh = k[:, lo:lo + hd]
        vh = v[:, lo:lo + hd]
        s = lax.dot_general(qh, kh, dn, preferred_element_type=jnp.float32)
        s = s * scale + mask
        m = jnp.max(s, axis=-1, keepdims=True)
        p = jnp.exp(s - m)
        denom = jnp.sum(p, axis=-1, keepdims=True)
        p = p * pl.reciprocal(denom, approx=True)                 # EUP slot
        # write head output directly into the (N, D) scratch slab (no concat)
        cat_ref[:, lo:lo + hd] = jnp.dot(p, vh,
                                         preferred_element_type=jnp.float32)

    attn = jnp.dot(cat_ref[...], wo, preferred_element_type=jnp.float32) + bo

    # ---- final linear into a lane-dense padded (N, 128) tile ----
    o_ref[...] = (jnp.dot(attn, wout_ref[...],
                          preferred_element_type=jnp.float32)
                  + bout_ref[...]).astype(o_ref.dtype)


# -------------------------------- wrapper ------------------------------------
def _batch_mask(n_rows, batch_size):
    """(N, N) additive mask: 0 within the same batch element, -1e30 across."""
    s = n_rows // batch_size
    ids = np.arange(n_rows) // s
    same = ids[:, None] == ids[None, :]
    return np.where(same, 0.0, -1e30).astype(np.float32)


def self_attentive_vanilla_nn_forward(x, params, batch_size):
    """x: (batch_size * n_context, IN_DIM) -> (batch_size * n_context, OUT_DIM)."""
    assert x.ndim == 2, "Input must be of shape [batch_size*n_context, in_dim]."
    n = x.shape[0]
    d = HIDDEN_DIMS[-1]
    assert d % NUM_HEADS == 0, "hidden dim must be divisible by num_heads"
    assert n % batch_size == 0, "rows must be divisible by batch_size"

    hidden = params["hidden"]
    num_hidden = len(hidden)
    w_attn, b_attn = params["attn"]
    w_out_p, b_out_p = params["out_padded"]

    mask = jnp.asarray(_batch_mask(n, batch_size))     # numpy constant -> device
    flat_hidden = [a for wb in hidden for a in wb]

    out_padded = pl.pallas_call(
        partial(_fused_kernel, num_hidden=num_hidden, num_heads=NUM_HEADS),
        out_shape=jax.ShapeDtypeStruct((n, OUT_PAD), jnp.float32),
        in_specs=[_VMEM] * (2 + 2 * num_hidden + 4),
        out_specs=_VMEM,
        scratch_shapes=[pltpu.VMEM((n, d), jnp.float32)],
    )(x, mask, *flat_hidden, w_attn, b_attn, w_out_p, b_out_p)
    return out_padded[:, :OUT_DIM]


# ----------------------------- parameter init --------------------------------
def init_params(key):
    """Deterministic synthetic weights. Linear weights stored as (in, out)."""
    dims = [IN_DIM] + HIDDEN_DIMS + [OUT_DIM]
    keys = jax.random.split(key, 2 * (len(dims) - 1) + 8)
    ki = 0
    layers = []
    for i in range(len(dims) - 1):
        w = 0.1 * jax.random.normal(keys[ki], (dims[i], dims[i + 1]), jnp.float32); ki += 1
        b = 0.1 * jax.random.normal(keys[ki], (1, dims[i + 1]), jnp.float32); ki += 1
        layers.append((w, b))
    hidden = layers[:-1]
    w_out, b_out = layers[-1]

    D = HIDDEN_DIMS[-1]
    ws, bs = [], []
    for _ in range(4):   # Wq, Wk, Wv, Wo
        w = 0.1 * jax.random.normal(keys[ki], (D, D), jnp.float32); ki += 1
        b = 0.1 * jax.random.normal(keys[ki], (1, D), jnp.float32); ki += 1
        ws.append(w); bs.append(b)
    w_attn = jnp.stack(ws, axis=0)                       # (4, D, D)
    b_attn = jnp.stack(bs, axis=0)                       # (4, 1, D)

    # zero-padded, lane-dense final layer (columns >= OUT_DIM are zeros)
    w_out_p = jnp.zeros((D, OUT_PAD), jnp.float32).at[:, :OUT_DIM].set(w_out)
    b_out_p = jnp.zeros((1, OUT_PAD), jnp.float32).at[:, :OUT_DIM].set(b_out)

    return {"hidden": hidden,
            "out": (w_out, b_out),
            "out_padded": (w_out_p, b_out_p),
            "attn": (w_attn, b_attn)}


# ---------------------------- pure-JAX reference -----------------------------
def _ref_forward(x, params, batch_size):
    h = x
    for (w, b) in params["hidden"]:
        h = jnp.maximum(h @ w + b, 0.0)
    D = HIDDEN_DIMS[-1]
    h3 = h.reshape(batch_size, -1, D)
    w_attn, b_attn = params["attn"]
    wq, wk, wv, wo = w_attn[0], w_attn[1], w_attn[2], w_attn[3]
    bq, bk, bv, bo = b_attn[0], b_attn[1], b_attn[2], b_attn[3]
    q = h3 @ wq + bq
    k = h3 @ wk + bk
    v = h3 @ wv + bv
    hd = D // NUM_HEADS
    B, S, _ = h3.shape
    qh = q.reshape(B, S, NUM_HEADS, hd).transpose(0, 2, 1, 3)
    kh = k.reshape(B, S, NUM_HEADS, hd).transpose(0, 2, 1, 3)
    vh = v.reshape(B, S, NUM_HEADS, hd).transpose(0, 2, 1, 3)
    s = jnp.einsum("bhqd,bhkd->bhqk", qh, kh) / jnp.sqrt(jnp.float32(hd))
    p = jax.nn.softmax(s, axis=-1)
    o = jnp.einsum("bhqk,bhkd->bhqd", p, vh).transpose(0, 2, 1, 3).reshape(B, S, D)
    o = o @ wo + bo
    h = o.reshape(-1, D)
    w, b = params["out"]
    return h @ w + b


# ----------------------------------- main -------------------------------------
if __name__ == "__main__":
    key = jax.random.PRNGKey(0)
    pkey, xkey = jax.random.split(key)
    params = init_params(pkey)
    x = jax.random.normal(xkey, (BATCH * N_CTX, IN_DIM), jnp.float32)

    fwd = jax.jit(self_attentive_vanilla_nn_forward, static_argnums=2)
    out = fwd(x, params, BATCH)
    out = jax.block_until_ready(out)

    ref = _ref_forward(x, params, BATCH)
    assert out.shape == (BATCH * N_CTX, OUT_DIM)
    # tolerance loosened slightly vs. exact division because the softmax
    # denominator uses the EUP approx reciprocal (pl.reciprocal(approx=True))
    assert jnp.allclose(out, ref, atol=2e-3, rtol=2e-3), "mismatch vs reference"
    print("KERNEL_OK")
</pallas_src>

<mosaic_0001>
module attributes {stable_mosaic.version = 11 : i64} {
  func.func @_fused_kernel(%arg0: memref<16x8xf32, #tpu.memory_space<vmem>>, %arg1: memref<16x16xf32, #tpu.memory_space<vmem>>, %arg2: memref<8x32xf32, #tpu.memory_space<vmem>>, %arg3: memref<1x32xf32, #tpu.memory_space<vmem>>, %arg4: memref<32x32xf32, #tpu.memory_space<vmem>>, %arg5: memref<1x32xf32, #tpu.memory_space<vmem>>, %arg6: memref<4x32x32xf32, #tpu.memory_space<vmem>>, %arg7: memref<4x1x32xf32, #tpu.memory_space<vmem>>, %arg8: memref<32x128xf32, #tpu.memory_space<vmem>>, %arg9: memref<1x128xf32, #tpu.memory_space<vmem>>, %arg10: memref<16x128xf32, #tpu.memory_space<vmem>>, %arg11: memref<16x32xf32, #tpu.memory_space<vmem>>) attributes {dimension_semantics = [], scalar_prefetch = 0 : i64, scratch_operands = 1 : i64, tpu.core_type = #tpu.core_type<tc>} {
    %c0 = arith.constant 0 : index
    %c0_0 = arith.constant 0 : index
    %0 = vector.load %arg0[%c0, %c0_0] : memref<16x8xf32, #tpu.memory_space<vmem>>, vector<16x8xf32>
    %c0_1 = arith.constant 0 : index
    %c0_2 = arith.constant 0 : index
    %1 = vector.load %arg2[%c0_1, %c0_2] : memref<8x32xf32, #tpu.memory_space<vmem>>, vector<8x32xf32>
    %c0_3 = arith.constant 0 : index
    %c0_4 = arith.constant 0 : index
    %2 = vector.load %arg3[%c0_3, %c0_4] : memref<1x32xf32, #tpu.memory_space<vmem>>, vector<1x32xf32>
    %cst = arith.constant dense<0.000000e+00> : vector<16x32xf32>
    %3 = tpu.matmul %0, %1, %cst {dimension_numbers = #tpu.dot_dimension_numbers<[1], [0], [0], [1], [0, 0, 1, 1], [], []>} : vector<16x8xf32>, vector<8x32xf32>, vector<16x32xf32> -> vector<16x32xf32>
    %4 = vector.broadcast %2 : vector<1x32xf32> to vector<16x32xf32>
    %5 = arith.addf %3, %4 : vector<16x32xf32>
    %cst_5 = arith.constant 0.000000e+00 : f32
    %6 = vector.broadcast %cst_5 : f32 to vector<16x32xf32>
    %7 = arith.maximumf %5, %6 : vector<16x32xf32>
    %c0_6 = arith.constant 0 : index
    %c0_7 = arith.constant 0 : index
    %8 = vector.load %arg4[%c0_6, %c0_7] : memref<32x32xf32, #tpu.memory_space<vmem>>, vector<32x32xf32>
    %c0_8 = arith.constant 0 : index
    %c0_9 = arith.constant 0 : index
    %9 = vector.load %arg5[%c0_8, %c0_9] : memref<1x32xf32, #tpu.memory_space<vmem>>, vector<1x32xf32>
    %cst_10 = arith.constant dense<0.000000e+00> : vector<16x32xf32>
    %10 = tpu.matmul %7, %8, %cst_10 {dimension_numbers = #tpu.dot_dimension_numbers<[1], [0], [0], [1], [0, 0, 1, 1], [], []>} : vector<16x32xf32>, vector<32x32xf32>, vector<16x32xf32> -> vector<16x32xf32>
    %11 = vector.broadcast %9 : vector<1x32xf32> to vector<16x32xf32>
    %12 = arith.addf %10, %11 : vector<16x32xf32>
    %cst_11 = arith.constant 0.000000e+00 : f32
    %13 = vector.broadcast %cst_11 : f32 to vector<16x32xf32>
    %14 = arith.maximumf %12, %13 : vector<16x32xf32>
    %c0_12 = arith.constant 0 : index
    %c0_13 = arith.constant 0 : index
    %c0_14 = arith.constant 0 : index
    %15 = vector.load %arg6[%c0_12, %c0_13, %c0_14] : memref<4x32x32xf32, #tpu.memory_space<vmem>>, vector<1x32x32xf32>
    %16 = vector.shape_cast %15 : vector<1x32x32xf32> to vector<32x32xf32>
    %c1 = arith.constant 1 : index
    %c0_15 = arith.constant 0 : index
    %c0_16 = arith.constant 0 : index
    %17 = vector.load %arg6[%c1, %c0_15, %c0_16] : memref<4x32x32xf32, #tpu.memory_space<vmem>>, vector<1x32x32xf32>
    %18 = vector.shape_cast %17 : vector<1x32x32xf32> to vector<32x32xf32>
    %c2 = arith.constant 2 : index
    %c0_17 = arith.constant 0 : index
    %c0_18 = arith.constant 0 : index
    %19 = vector.load %arg6[%c2, %c0_17, %c0_18] : memref<4x32x32xf32, #tpu.memory_space<vmem>>, vector<1x32x32xf32>
    %20 = vector.shape_cast %19 : vector<1x32x32xf32> to vector<32x32xf32>
    %c3 = arith.constant 3 : index
    %c0_19 = arith.constant 0 : index
    %c0_20 = arith.constant 0 : index
    %21 = vector.load %arg6[%c3, %c0_19, %c0_20] : memref<4x32x32xf32, #tpu.memory_space<vmem>>, vector<1x32x32xf32>
    %22 = vector.shape_cast %21 : vector<1x32x32xf32> to vector<32x32xf32>
    %c0_21 = arith.constant 0 : index
    %c0_22 = arith.constant 0 : index
    %c0_23 = arith.constant 0 : index
    %23 = vector.load %arg7[%c0_21, %c0_22, %c0_23] : memref<4x1x32xf32, #tpu.memory_space<vmem>>, vector<1x1x32xf32>
    %24 = vector.shape_cast %23 : vector<1x1x32xf32> to vector<1x32xf32>
    %c1_24 = arith.constant 1 : index
    %c0_25 = arith.constant 0 : index
    %c0_26 = arith.constant 0 : index
    %25 = vector.load %arg7[%c1_24, %c0_25, %c0_26] : memref<4x1x32xf32, #tpu.memory_space<vmem>>, vector<1x1x32xf32>
    %26 = vector.shape_cast %25 : vector<1x1x32xf32> to vector<1x32xf32>
    %c2_27 = arith.constant 2 : index
    %c0_28 = arith.constant 0 : index
    %c0_29 = arith.constant 0 : index
    %27 = vector.load %arg7[%c2_27, %c0_28, %c0_29] : memref<4x1x32xf32, #tpu.memory_space<vmem>>, vector<1x1x32xf32>
    %28 = vector.shape_cast %27 : vector<1x1x32xf32> to vector<1x32xf32>
    %c3_30 = arith.constant 3 : index
    %c0_31 = arith.constant 0 : index
    %c0_32 = arith.constant 0 : index
    %29 = vector.load %arg7[%c3_30, %c0_31, %c0_32] : memref<4x1x32xf32, #tpu.memory_space<vmem>>, vector<1x1x32xf32>
    %30 = vector.shape_cast %29 : vector<1x1x32xf32> to vector<1x32xf32>
    %cst_33 = arith.constant dense<0.000000e+00> : vector<16x32xf32>
    %31 = tpu.matmul %14, %16, %cst_33 {dimension_numbers = #tpu.dot_dimension_numbers<[1], [0], [0], [1], [0, 0, 1, 1], [], []>} : vector<16x32xf32>, vector<32x32xf32>, vector<16x32xf32> -> vector<16x32xf32>
    %32 = vector.broadcast %24 : vector<1x32xf32> to vector<16x32xf32>
    %33 = arith.addf %31, %32 : vector<16x32xf32>
    %cst_34 = arith.constant dense<0.000000e+00> : vector<16x32xf32>
    %34 = tpu.matmul %14, %18, %cst_34 {dimension_numbers = #tpu.dot_dimension_numbers<[1], [0], [0], [1], [0, 0, 1, 1], [], []>} : vector<16x32xf32>, vector<32x32xf32>, vector<16x32xf32> -> vector<16x32xf32>
    %35 = vector.broadcast %26 : vector<1x32xf32> to vector<16x32xf32>
    %36 = arith.addf %34, %35 : vector<16x32xf32>
    %cst_35 = arith.constant dense<0.000000e+00> : vector<16x32xf32>
    %37 = tpu.matmul %14, %20, %cst_35 {dimension_numbers = #tpu.dot_dimension_numbers<[1], [0], [0], [1], [0, 0, 1, 1], [], []>} : vector<16x32xf32>, vector<32x32xf32>, vector<16x32xf32> -> vector<16x32xf32>
    %38 = vector.broadcast %28 : vector<1x32xf32> to vector<16x32xf32>
    %39 = arith.addf %37, %38 : vector<16x32xf32>
    %c0_36 = arith.constant 0 : index
    %c0_37 = arith.constant 0 : index
    %40 = vector.load %arg1[%c0_36, %c0_37] : memref<16x16xf32, #tpu.memory_space<vmem>>, vector<16x16xf32>
    %41 = vector.extract_strided_slice %33 {offsets = [0, 0], sizes = [16, 8], strides = [1, 1]} : vector<16x32xf32> to vector<16x8xf32>
    %42 = vector.extract_strided_slice %36 {offsets = [0, 0], sizes = [16, 8], strides = [1, 1]} : vector<16x32xf32> to vector<16x8xf32>
    %43 = vector.extract_strided_slice %39 {offsets = [0, 0], sizes = [16, 8], strides = [1, 1]} : vector<16x32xf32> to vector<16x8xf32>
    %cst_38 = arith.constant dense<0.000000e+00> : vector<16x16xf32>
    %44 = tpu.matmul %41, %42, %cst_38 {dimension_numbers = #tpu.dot_dimension_numbers<[1], [1], [0], [0], [0, 0, 1, 0], [], []>} : vector<16x8xf32>, vector<16x8xf32>, vector<16x16xf32> -> vector<16x16xf32>
    %cst_39 = arith.constant 0.353553385 : f32
    %45 = vector.broadcast %cst_39 : f32 to vector<16x16xf32>
    %46 = arith.mulf %44, %45 : vector<16x16xf32>
    %47 = arith.addf %46, %40 : vector<16x16xf32>
    %cst_40 = arith.constant dense<0xFF800000> : vector<16xf32>
    %48 = vector.multi_reduction <maximumf>, %47, %cst_40 [1] : vector<16x16xf32> to vector<16xf32>
    %49 = vector.shape_cast %48 : vector<16xf32> to vector<16x1xf32>
    %50 = vector.broadcast %49 : vector<16x1xf32> to vector<16x16xf32>
    %51 = arith.subf %47, %50 : vector<16x16xf32>
    %52 = math.exp %51 : vector<16x16xf32>
    %cst_41 = arith.constant dense<0.000000e+00> : vector<16xf32>
    %53 = vector.multi_reduction <add>, %52, %cst_41 [1] : vector<16x16xf32> to vector<16xf32>
    %54 = vector.shape_cast %53 : vector<16xf32> to vector<16x1xf32>
    %55 = tpu.reciprocal %54 {approx = true} : vector<16x1xf32> -> vector<16x1xf32>
    %56 = vector.broadcast %55 : vector<16x1xf32> to vector<16x16xf32>
    %57 = arith.mulf %52, %56 : vector<16x16xf32>
    %cst_42 = arith.constant dense<0.000000e+00> : vector<16x8xf32>
    %58 = tpu.matmul %57, %43, %cst_42 {dimension_numbers = #tpu.dot_dimension_numbers<[1], [0], [0], [1], [0, 0, 1, 1], [], []>} : vector<16x16xf32>, vector<16x8xf32>, vector<16x8xf32> -> vector<16x8xf32>
    %c0_43 = arith.constant 0 : index
    %c0_44 = arith.constant 0 : index
    %59 = vector.load %arg11[%c0_43, %c0_44] : memref<16x32xf32, #tpu.memory_space<vmem>>, vector<16x8xf32>
    tpu.vector_store %arg11[%c0_43, %c0_44], %58 {strides = array<i32>} : memref<16x32xf32, #tpu.memory_space<vmem>>, vector<16x8xf32>,
    %60 = vector.extract_strided_slice %33 {offsets = [0, 8], sizes = [16, 8], strides = [1, 1]} : vector<16x32xf32> to vector<16x8xf32>
    %61 = vector.extract_strided_slice %36 {offsets = [0, 8], sizes = [16, 8], strides = [1, 1]} : vector<16x32xf32> to vector<16x8xf32>
    %62 = vector.extract_strided_slice %39 {offsets = [0, 8], sizes = [16, 8], strides = [1, 1]} : vector<16x32xf32> to vector<16x8xf32>
    %cst_45 = arith.constant dense<0.000000e+00> : vector<16x16xf32>
    %63 = tpu.matmul %60, %61, %cst_45 {dimension_numbers = #tpu.dot_dimension_numbers<[1], [1], [0], [0], [0, 0, 1, 0], [], []>} : vector<16x8xf32>, vector<16x8xf32>, vector<16x16xf32> -> vector<16x16xf32>
    %cst_46 = arith.constant 0.353553385 : f32
    %64 = vector.broadcast %cst_46 : f32 to vector<16x16xf32>
    %65 = arith.mulf %63, %64 : vector<16x16xf32>
    %66 = arith.addf %65, %40 : vector<16x16xf32>
    %cst_47 = arith.constant dense<0xFF800000> : vector<16xf32>
    %67 = vector.multi_reduction <maximumf>, %66, %cst_47 [1] : vector<16x16xf32> to vector<16xf32>
    %68 = vector.shape_cast %67 : vector<16xf32> to vector<16x1xf32>
    %69 = vector.broadcast %68 : vector<16x1xf32> to vector<16x16xf32>
    %70 = arith.subf %66, %69 : vector<16x16xf32>
    %71 = math.exp %70 : vector<16x16xf32>
    %cst_48 = arith.constant dense<0.000000e+00> : vector<16xf32>
    %72 = vector.multi_reduction <add>, %71, %cst_48 [1] : vector<16x16xf32> to vector<16xf32>
    %73 = vector.shape_cast %72 : vector<16xf32> to vector<16x1xf32>
    %74 = tpu.reciprocal %73 {approx = true} : vector<16x1xf32> -> vector<16x1xf32>
    %75 = vector.broadcast %74 : vector<16x1xf32> to vector<16x16xf32>
    %76 = arith.mulf %71, %75 : vector<16x16xf32>
    %cst_49 = arith.constant dense<0.000000e+00> : vector<16x8xf32>
    %77 = tpu.matmul %76, %62, %cst_49 {dimension_numbers = #tpu.dot_dimension_numbers<[1], [0], [0], [1], [0, 0, 1, 1], [], []>} : vector<16x16xf32>, vector<16x8xf32>, vector<16x8xf32> -> vector<16x8xf32>
    %c0_50 = arith.constant 0 : index
    %c8 = arith.constant 8 : index
    %78 = vector.load %arg11[%c0_50, %c8] : memref<16x32xf32, #tpu.memory_space<vmem>>, vector<16x8xf32>
    tpu.vector_store %arg11[%c0_50, %c8], %77 {strides = array<i32>} : memref<16x32xf32, #tpu.memory_space<vmem>>, vector<16x8xf32>,
    %79 = vector.extract_strided_slice %33 {offsets = [0, 16], sizes = [16, 8], strides = [1, 1]} : vector<16x32xf32> to vector<16x8xf32>
    %80 = vector.extract_strided_slice %36 {offsets = [0, 16], sizes = [16, 8], strides = [1, 1]} : vector<16x32xf32> to vector<16x8xf32>
    %81 = vector.extract_strided_slice %39 {offsets = [0, 16], sizes = [16, 8], strides = [1, 1]} : vector<16x32xf32> to vector<16x8xf32>
    %cst_51 = arith.constant dense<0.000000e+00> : vector<16x16xf32>
    %82 = tpu.matmul %79, %80, %cst_51 {dimension_numbers = #tpu.dot_dimension_numbers<[1], [1], [0], [0], [0, 0, 1, 0], [], []>} : vector<16x8xf32>, vector<16x8xf32>, vector<16x16xf32> -> vector<16x16xf32>
    %cst_52 = arith.constant 0.353553385 : f32
    %83 = vector.broadcast %cst_52 : f32 to vector<16x16xf32>
    %84 = arith.mulf %82, %83 : vector<16x16xf32>
    %85 = arith.addf %84, %40 : vector<16x16xf32>
    %cst_53 = arith.constant dense<0xFF800000> : vector<16xf32>
    %86 = vector.multi_reduction <maximumf>, %85, %cst_53 [1] : vector<16x16xf32> to vector<16xf32>
    %87 = vector.shape_cast %86 : vector<16xf32> to vector<16x1xf32>
    %88 = vector.broadcast %87 : vector<16x1xf32> to vector<16x16xf32>
    %89 = arith.subf %85, %88 : vector<16x16xf32>
    %90 = math.exp %89 : vector<16x16xf32>
    %cst_54 = arith.constant dense<0.000000e+00> : vector<16xf32>
    %91 = vector.multi_reduction <add>, %90, %cst_54 [1] : vector<16x16xf32> to vector<16xf32>
    %92 = vector.shape_cast %91 : vector<16xf32> to vector<16x1xf32>
    %93 = tpu.reciprocal %92 {approx = true} : vector<16x1xf32> -> vector<16x1xf32>
    %94 = vector.broadcast %93 : vector<16x1xf32> to vector<16x16xf32>
    %95 = arith.mulf %90, %94 : vector<16x16xf32>
    %cst_55 = arith.constant dense<0.000000e+00> : vector<16x8xf32>
    %96 = tpu.matmul %95, %81, %cst_55 {dimension_numbers = #tpu.dot_dimension_numbers<[1], [0], [0], [1], [0, 0, 1, 1], [], []>} : vector<16x16xf32>, vector<16x8xf32>, vector<16x8xf32> -> vector<16x8xf32>
    %c0_56 = arith.constant 0 : index
    %c16 = arith.constant 16 : index
    %97 = vector.load %arg11[%c0_56, %c16] : memref<16x32xf32, #tpu.memory_space<vmem>>, vector<16x8xf32>
    tpu.vector_store %arg11[%c0_56, %c16], %96 {strides = array<i32>} : memref<16x32xf32, #tpu.memory_space<vmem>>, vector<16x8xf32>,
    %98 = vector.extract_strided_slice %33 {offsets = [0, 24], sizes = [16, 8], strides = [1, 1]} : vector<16x32xf32> to vector<16x8xf32>
    %99 = vector.extract_strided_slice %36 {offsets = [0, 24], sizes = [16, 8], strides = [1, 1]} : vector<16x32xf32> to vector<16x8xf32>
    %100 = vector.extract_strided_slice %39 {offsets = [0, 24], sizes = [16, 8], strides = [1, 1]} : vector<16x32xf32> to vector<16x8xf32>
    %cst_57 = arith.constant dense<0.000000e+00> : vector<16x16xf32>
    %101 = tpu.matmul %98, %99, %cst_57 {dimension_numbers = #tpu.dot_dimension_numbers<[1], [1], [0], [0], [0, 0, 1, 0], [], []>} : vector<16x8xf32>, vector<16x8xf32>, vector<16x16xf32> -> vector<16x16xf32>
    %cst_58 = arith.constant 0.353553385 : f32
    %102 = vector.broadcast %cst_58 : f32 to vector<16x16xf32>
    %103 = arith.mulf %101, %102 : vector<16x16xf32>
    %104 = arith.addf %103, %40 : vector<16x16xf32>
    %cst_59 = arith.constant dense<0xFF800000> : vector<16xf32>
    %105 = vector.multi_reduction <maximumf>, %104, %cst_59 [1] : vector<16x16xf32> to vector<16xf32>
    %106 = vector.shape_cast %105 : vector<16xf32> to vector<16x1xf32>
    %107 = vector.broadcast %106 : vector<16x1xf32> to vector<16x16xf32>
    %108 = arith.subf %104, %107 : vector<16x16xf32>
    %109 = math.exp %108 : vector<16x16xf32>
    %cst_60 = arith.constant dense<0.000000e+00> : vector<16xf32>
    %110 = vector.multi_reduction <add>, %109, %cst_60 [1] : vector<16x16xf32> to vector<16xf32>
    %111 = vector.shape_cast %110 : vector<16xf32> to vector<16x1xf32>
    %112 = tpu.reciprocal %111 {approx = true} : vector<16x1xf32> -> vector<16x1xf32>
    %113 = vector.broadcast %112 : vector<16x1xf32> to vector<16x16xf32>
    %114 = arith.mulf %109, %113 : vector<16x16xf32>
    %cst_61 = arith.constant dense<0.000000e+00> : vector<16x8xf32>
    %115 = tpu.matmul %114, %100, %cst_61 {dimension_numbers = #tpu.dot_dimension_numbers<[1], [0], [0], [1], [0, 0, 1, 1], [], []>} : vector<16x16xf32>, vector<16x8xf32>, vector<16x8xf32> -> vector<16x8xf32>
    %c0_62 = arith.constant 0 : index
    %c24 = arith.constant 24 : index
    %116 = vector.load %arg11[%c0_62, %c24] : memref<16x32xf32, #tpu.memory_space<vmem>>, vector<16x8xf32>
    tpu.vector_store %arg11[%c0_62, %c24], %115 {strides = array<i32>} : memref<16x32xf32, #tpu.memory_space<vmem>>, vector<16x8xf32>,
    %c0_63 = arith.constant 0 : index
    %c0_64 = arith.constant 0 : index
    %117 = vector.load %arg11[%c0_63, %c0_64] : memref<16x32xf32, #tpu.memory_space<vmem>>, vector<16x32xf32>
    %cst_65 = arith.constant dense<0.000000e+00> : vector<16x32xf32>
    %118 = tpu.matmul %117, %22, %cst_65 {dimension_numbers = #tpu.dot_dimension_numbers<[1], [0], [0], [1], [0, 0, 1, 1], [], []>} : vector<16x32xf32>, vector<32x32xf32>, vector<16x32xf32> -> vector<16x32xf32>
    %119 = vector.broadcast %30 : vector<1x32xf32> to vector<16x32xf32>
    %120 = arith.addf %118, %119 : vector<16x32xf32>
    %c0_66 = arith.constant 0 : index
    %c0_67 = arith.constant 0 : index
    %121 = vector.load %arg8[%c0_66, %c0_67] : memref<32x128xf32, #tpu.memory_space<vmem>>, vector<32x128xf32>
    %cst_68 = arith.constant dense<0.000000e+00> : vector<16x128xf32>
    %122 = tpu.matmul %120, %121, %cst_68 {dimension_numbers = #tpu.dot_dimension_numbers<[1], [0], [0], [1], [0, 0, 1, 1], [], []>} : vector<16x32xf32>, vector<32x128xf32>, vector<16x128xf32> -> vector<16x128xf32>
    %c0_69 = arith.constant 0 : index
    %c0_70 = arith.constant 0 : index
    %123 = vector.load %arg9[%c0_69, %c0_70] : memref<1x128xf32, #tpu.memory_space<vmem>>, vector<1x128xf32>
    %124 = vector.broadcast %123 : vector<1x128xf32> to vector<16x128xf32>
    %125 = arith.addf %122, %124 : vector<16x128xf32>
    %c0_71 = arith.constant 0 : index
    %c0_72 = arith.constant 0 : index
    %126 = vector.load %arg10[%c0_71, %c0_72] : memref<16x128xf32, #tpu.memory_space<vmem>>, vector<16x128xf32>
    tpu.vector_store %arg10[%c0_71, %c0_72], %125 {strides = array<i32>} : memref<16x128xf32, #tpu.memory_space<vmem>>, vector<16x128xf32>,
    return
  }
}

</mosaic_0001>

<bundles_post_ra>
// kernel: self_attentive_vanilla_nn_forward.1
= control target key start
LH: loop header
LB: loop body
LE: loop exit
PB: predicated region body
PF: predicated region fallthrough
CT: control target
= control target key end

     0   :  { %15 = vsyncpa [#allocation4], 0  ;;  %s2379_s0 = inlined_call_operand.vmem [shape: f32[16,8], index: 0, kind: input, shape index: {}]   ;;  %s2380_s1 = inlined_call_operand.vmem [shape: f32[16,16], index: 1, kind: input, shape index: {}]   ;;  %s2381_s2 = inlined_call_operand.hbm [shape: f32[8,32], index: 2, kind: input, shape index: {}]   ;;  %s2382_s3 = inlined_call_operand.vmem [shape: f32[1,32], index: 3, kind: input, shape index: {}]   ;;  %s2383_s4 = inlined_call_operand.vmem [shape: f32[32,32], index: 4, kind: input, shape index: {}]   ;;  %s2384_s5 = inlined_call_operand.vmem [shape: f32[1,32], index: 5, kind: input, shape index: {}]   ;;  %s2385_s6 = inlined_call_operand.hbm [shape: f32[4,32,32], index: 6, kind: input, shape index: {}]   ;;  %s2386_s7 = inlined_call_operand.hbm [shape: f32[4,1,32], index: 7, kind: input, shape index: {}]   ;;  %s2387_s8 = inlined_call_operand.hbm [shape: f32[32,128], index: 8, kind: input, shape index: {}]   ;;  %s2388_s9 = inlined_call_operand.vmem [shape: f32[1,128], index: 9, kind: input, shape index: {}]   ;;  %s2389_s10 = inlined_call_operand.vmem [shape: f32[16,128], index: 10, kind: output, shape index: {}]  }
   0x1   :  { %16 = vsyncpa [#allocation6], 0 }
   0x2   :  { %17 = vsyncpa [#allocation9], 0  ;;  %s2087_s13 = smov [#allocation5]   ;;  %s1993_s17 = scalar_lea.hbm %s2385_s6, 2048 }
   0x3   :  { %s43_s14 = sshll.u32 %s2087_s13, 4  ;;  %p1994_p0 = scmp.ne.s32.totalorder %s2385_s6, %s1993_s17  ;;  %s44_s14 = int_to_ptr.vmem [resolvable:$true] %s43_s14 }
   0x4   :  { %p1997_p1 = scmp.lt.u32.totalorder %s1993_s17, %s2385_s6 }
   0x6   :  { %p1999_p2 = pnand %p1997_p1, %p1994_p0 }
   0x8   :  { %2002 = shalt.err (!%p1999_p2)
}
   0x9   :  { %s2003_s22 = scalar_lea.vmem %s44_s14, 2048  ;;  %p2008_p4 = scmp.lt.s32.totalorder %s44_s14, %s44_s14 }
   0xa   :  { %p2004_p3 = scmp.ne.s32.totalorder %s44_s14, %s2003_s22  ;;  %p2009_p5 = scmp.lt.s32.totalorder %s2003_s22, %s2003_s22 }
   0xc   :  { %p2010_p6 = por %p2009_p5, %p2008_p4 }
   0xe   :  { %p2011_p7 = pnand %p2010_p6, %p2004_p3 }
  0x10   :  { %2014 = shalt.err (!%p2011_p7)
}
  0x11   :  { %s2088_s23 = smov 128   ;;  %s2089_s24 = smov 8  }
  0x12   :  { %49 = dma.hbm_to_vmem [thread:$0]  %s2385_s6, 2048, %s44_s14, [#allocation6], %s2088_s23, %s2088_s23, %s2089_s24  }
  0x13   :  { %s2090_s27 = smov [#allocation3]   ;;  %s2091_s29 = smov [#allocation7]  }
  0x14   :  { %s28_s28 = sshll.u32 %s2090_s27, 4  ;;  %s55_s30 = sshll.u32 %s2091_s29, 4  ;;  %s29_s28 = int_to_ptr.vmem [resolvable:$true] %s28_s28  ;;  %s56_s30 = int_to_ptr.vmem [resolvable:$true] %s55_s30 }
  0x15   :  { %s2015_s13 = scalar_lea.hbm %s2381_s2, 128 }
  0x16   :  { %p2016_p8 = scmp.ne.s32.totalorder %s2381_s2, %s2015_s13  ;;  %p2019_p9 = scmp.lt.u32.totalorder %s2015_s13, %s2381_s2 }
  0x18   :  { %p2021_p10 = pnand %p2019_p9, %p2016_p8 }
  0x1a   :  { %2024 = shalt.err (!%p2021_p10)
}
  0x1b   :  { %s2025_s6 = scalar_lea.vmem %s29_s28, 128  ;;  %p2030_p12 = scmp.lt.s32.totalorder %s29_s28, %s29_s28 }
  0x1c   :  { %p2026_p11 = scmp.ne.s32.totalorder %s29_s28, %s2025_s6  ;;  %p2031_p13 = scmp.lt.s32.totalorder %s2025_s6, %s2025_s6 }
  0x1e   :  { %p2032_p0 = por %p2031_p13, %p2030_p12 }
  0x20   :  { %p2033_p1 = pnand %p2032_p0, %p2026_p11 }
  0x22   :  { %2036 = shalt.err (!%p2033_p1)
}
  0x23   :  { %31 = dma.hbm_to_vmem [thread:$0]  %s2381_s2, 128, %s29_s28, [#allocation4]  }
  0x24   :  { %s2037_s22 = scalar_lea.hbm %s2386_s7, 64 }
  0x25   :  { %p2038_p2 = scmp.ne.s32.totalorder %s2386_s7, %s2037_s22  ;;  %p2041_p3 = scmp.lt.u32.totalorder %s2037_s22, %s2386_s7 }
  0x27   :  { %p2043_p4 = pnand %p2041_p3, %p2038_p2 }
  0x29   :  { %2046 = shalt.err (!%p2043_p4)
}
  0x2a   :  { %s2047_s11 = scalar_lea.vmem %s56_s30, 64  ;;  %p2052_p6 = scmp.lt.s32.totalorder %s56_s30, %s56_s30 }
  0x2b   :  { %p2048_p5 = scmp.ne.s32.totalorder %s56_s30, %s2047_s11  ;;  %p2053_p7 = scmp.lt.s32.totalorder %s2047_s11, %s2047_s11 }
  0x2d   :  { %p2054_p8 = por %p2053_p7, %p2052_p6 }
  0x2f   :  { %p2055_p9 = pnand %p2054_p8, %p2048_p5 }
  0x31   :  { %2058 = shalt.err (!%p2055_p9)
}
  0x32   :  { %s2092_s2 = smov 16   ;;  %s2093_s28 = smov 1  }
  0x33   :  { %61 = dma.hbm_to_vmem [thread:$0]  %s2386_s7, 64, %s56_s30, [#allocation6], %s2092_s2, %s2092_s2, %s2093_s28  }
  0x34   :  { %s2094_s15 = smov [#allocation8]   ;;  %s2059_s6 = scalar_lea.hbm %s2387_s8, 512 }
  0x35   :  { %s67_s16 = sshll.u32 %s2094_s15, 4  ;;  %p2060_p10 = scmp.ne.s32.totalorder %s2387_s8, %s2059_s6  ;;  %s68_s16 = int_to_ptr.vmem [resolvable:$true] %s67_s16 }
  0x36   :  { %p2063_p11 = scmp.lt.u32.totalorder %s2059_s6, %s2387_s8 }
  0x38   :  { %p2065_p12 = pnand %p2063_p11, %p2060_p10 }
  0x3a   :  { %2068 = shalt.err (!%p2065_p12)
}
  0x3b   :  { %s2069_s22 = scalar_lea.vmem %s68_s16, 512  ;;  %p2074_p0 = scmp.lt.s32.totalorder %s68_s16, %s68_s16 }
  0x3c   :  { %p2070_p13 = scmp.ne.s32.totalorder %s68_s16, %s2069_s22  ;;  %p2075_p1 = scmp.lt.s32.totalorder %s2069_s22, %s2069_s22 }
  0x3e   :  { %p2076_p2 = por %p2075_p1, %p2074_p0 }
  0x40   :  { %p2077_p3 = pnand %p2076_p2, %p2070_p13 }
  0x42   :  { %2080 = shalt.err (!%p2077_p3)
}
  0x43   :  { %73 = dma.hbm_to_vmem [thread:$0]  %s2387_s8, 512, %s68_s16, [#allocation9], %s2088_s23, %s2088_s23, %s2089_s24  }
  0x44   :  { %2081 = dma.done.wait [#allocation4], 128  }
  0x45   :  { %2082 = vsyncadd [#allocation4], 4294967168 }
  0x46   :  { %2083 = dma.done.wait [#allocation6], 2112  }
  0x47   :  { %2084 = vsyncadd [#allocation6], 4294965184 }
  0x48   :  { %2085 = dma.done.wait [#allocation9], 512  }
  0x49   :  { %2086 = vsyncadd [#allocation9], 4294966784  ;;  %vm98_vm0 = vcmask 64512   ;;  %v90_v0 = vld [vmem:[#allocation3] sm:$0xff]  ;;  %v89_v2 = vld [vmem:[%s2379_s0 + $0x8] sm:$0xff]  ;;  %vm193_vm1 = vcmask 261120  }
  0x4a   :  { %v88_v1 = vld [vmem:[%s2379_s0] sm:$0xff]  ;;  %1704 = vmatprep.subr.mxu0 %v90_v0  ;;  %v183_v4 = vld [vmem:[%s2383_s4 + $0x8] sm:$0xff]  ;;  %v184_v6 = vld [vmem:[%s2383_s4 + $0x10] sm:$0xff]  ;;  %vm645_vm3 = vcmask 130048   ;;  %s2097_s20 = smov 104   ;;  %vm965_vm4 = vcmask 130112  }
  0x4b   :  { %1706 = vmatprep.mubr.msk.f32.mxu0 %vm98_vm0, %v88_v1  ;;  %v182_v3 = vld [vmem:[%s2383_s4] sm:$0xff]  ;;  %1705 = vmatpush3.msra.mxu0 %v90_v0  ;;  %v185_v7 = vld [vmem:[%s2383_s4 + $0x18] sm:$0xff]  ;;  %v277_v9 = vld [vmem:[#allocation5] sm:$0xff]  ;;  %vm1180_vm5 = vcmask 195712   ;;  %vm1395_vm6 = vcmask 261312  }
  0x4c   :  { %v1831_v5 = vpack.c.bf16 %v183_v4, %v182_v3  ;;  %1707 = vmatmul.mubr.msk.f32.vlgmr.msra.gmra.mrb[0].mxu0 %vm98_vm0, %v89_v2  ;;  %v1835_v8 = vpack.c.bf16 %v185_v7, %v184_v6  ;;  %v278_v10 = vld [vmem:[#allocation5 + $0x8] sm:$0xff]  ;;  %v282_v11 = vld [vmem:[#allocation5 + $0x20] sm:$0xff]  ;;  %v1588_v15 = vld [vmem:[%s2382_s3] ss:$0 sm:$0xff] }
  0x4d   :  { %v1839_v12 = vpack.c.bf16 %v278_v10, %v277_v9  ;;  %v283_v13 = vld [vmem:[#allocation5 + $0x28] sm:$0xff]  ;;  %v279_v22 = vld [vmem:[#allocation5 + $0x10] sm:$0xff]  ;;  %v280_v23 = vld [vmem:[#allocation5 + $0x18] sm:$0xff] }
  0x4e   :  { %1832 = vmatprep.subr.bf16.mxu1 %v1831_v5  ;;  %v1847_v14 = vpack.c.bf16 %v283_v13, %v282_v11  ;;  %v1843_v24 = vpack.c.bf16 %v280_v23, %v279_v22  ;;  %v284_v25 = vld [vmem:[#allocation5 + $0x30] sm:$0xff]  ;;  %v285_v26 = vld [vmem:[#allocation5 + $0x38] sm:$0xff]  ;;  %v287_v28 = vld [vmem:[#allocation5 + $0x40] sm:$0xff] }
  0x4f   :  { %1834 = vmatpush3.bf16.msra.mxu1 %v1831_v5  ;;  %1840 = vmatprep.subr.bf16.mxu0 %v1839_v12  ;;  %v1851_v27 = vpack.c.bf16 %v285_v26, %v284_v25  ;;  %v288_v29 = vld [vmem:[#allocation5 + $0x48] sm:$0xff]  ;;  %v1591_v31 = vld [vmem:[%s2384_s5] ss:$0 sm:$0xff]  ;;  %v289_v36 = vld [vmem:[#allocation5 + $0x50] sm:$0xff]  ;;  %s2095_s5 = smov 120  }
  0x50   :  { %1836 = vmatprep.subr.bf16.mxu1 %v1835_v8  ;;  %1842 = vmatpush3.bf16.msra.mxu0 %v1839_v12  ;;  %v1855_v30 = vpack.c.bf16 %v288_v29, %v287_v28  ;;  %v290_v37 = vld [vmem:[#allocation5 + $0x58] sm:$0xff]  ;;  %v1597_v41 = vld [vmem:[#allocation7 + $0x1] ss:$0 sm:$0xff]  ;;  %v1594_v42 = vld [vmem:[#allocation7] ss:$0 sm:$0xff] }
  0x51   :  { %1844 = vmatprep.subr.bf16.mxu0 %v1843_v24  ;;  %v1859_v40 = vpack.c.bf16 %v290_v37, %v289_v36  ;;  %vm2248_vm2 = vmpackc.low %vm98_vm0, %vm98_vm0  ;;  %v1600_v53 = vld [vmem:[#allocation7 + $0x2] ss:$0 sm:$0xff]  ;;  %v2271_v63 = vld [vmem:[%s2380_s1] sm:$0xff] }
  0x52   :  { %v2276_v2 = vld [vmem:[%s2380_s1 + $0x8] sm:$0xff]  ;;  %s2096_s1 = smov 112  }
  0x53   :  { %1838 = vmatpush3.bf16.msra.mxu1 %v1835_v8 }
  0x54   :  { %1848 = vmatprep.subr.bf16.mxu1 %v1847_v14  ;;  %1846 = vmatpush3.bf16.msra.mxu0 %v1843_v24 }
  0x55   :  { %1856 = vmatprep.subr.bf16.mxu0 %v1855_v30 }
 0x11f   :  { %v1708_v16 = vpop.f32.mrb[0].mxu0 }
 0x120   :  { %v177_v17 = vadd.f32 %v1708_v16, %v1588_v15  ;;  %v171_v18 = vpop.f32.mrb[1].mxu0 }
 0x121   :  { %v172_v19 = vadd.f32 %v1588_v15, %v171_v18 }
 0x122   :  { %v181_v21 = vmax.f32 %v177_v17, 0.0 }
 0x123   :  { %v180_v20 = vmax.f32 %v172_v19, 0.0 }
 0x125   :  { %1717 = vmatprep.mubr.msk.f32.mxu1 %vm193_vm1, %v180_v20 }
 0x126   :  { %1718 = vmatmul.mubr.msk.f32.vlgmr.msra.gmra.mrb[0].mxu1 %vm193_vm1, %v181_v21 }
 0x127   :  { %1850 = vmatpush3.bf16.msra.mxu1 %v1847_v14 }
 0x128   :  { %1852 = vmatprep.subr.bf16.mxu1 %v1851_v27 }
 0x12b   :  { %1854 = vmatpush3.bf16.msra.mxu1 %v1851_v27 }
 0x1f9   :  { %v1719_v32 = vpop.f32.mrb[0].mxu1 }
 0x1fa   :  { %v272_v33 = vadd.f32 %v1719_v32, %v1591_v31  ;;  %v266_v34 = vpop.f32.mrb[1].mxu1 }
 0x1fb   :  { %v267_v35 = vadd.f32 %v1591_v31, %v266_v34 }
 0x1fc   :  { %v276_v39 = vmax.f32 %v272_v33, 0.0 }
 0x1fd   :  { %v275_v38 = vmax.f32 %v267_v35, 0.0 }
 0x1ff   :  { %1728 = vmatprep.mubr.msk.f32.mxu0 %vm193_vm1, %v275_v38  ;;  %1739 = vmatprep.mubr.msk.f32.mxu1 %vm193_vm1, %v275_v38 }
 0x200   :  { %1729 = vmatmul.mubr.msk.f32.vlgmr.msra.gmra.mrb[2].mxu0 %vm193_vm1, %v276_v39  ;;  %1740 = vmatmul.mubr.msk.f32.vlgmr.msra.gmra.mrb[2].mxu1 %vm193_vm1, %v276_v39 }
 0x201   :  { %1858 = vmatpush3.bf16.msra.mxu0 %v1855_v30  ;;  %1750 = vmatprep.mubr.msk.f32.mxu0 %vm193_vm1, %v275_v38 }
 0x202   :  { %1860 = vmatprep.subr.bf16.mxu0 %v1859_v40 }
 0x205   :  { %1862 = vmatpush3.bf16.msra.mxu0 %v1859_v40 }
 0x208   :  { %1751 = vmatmul.mubr.msk.f32.vlgmr.msra.gmra.mrb[4].mxu0 %vm193_vm1, %v276_v39 }
 0x2d3   :  { %v1730_v43 = vpop.f32.mrb[2].mxu0  ;;  %v1741_v44 = vpop.f32.mrb[2].mxu1 }
 0x2d4   :  { %v468_v45 = vadd.f32 %v1741_v44, %v1597_v41  ;;  %v381_v46 = vpop.f32.mrb[3].mxu0  ;;  %v462_v47 = vpop.f32.mrb[3].mxu1  ;;  %v2262_v58 = vadd.f32 %v1730_v43, %v1594_v42 }
 0x2d5   :  { %v2244_v48 = vadd.f32 %v1594_v42, %v381_v46  ;;  %v463_v49 = vadd.f32 %v1597_v41, %v462_v47 }
 0x2d7   :  { %751 = vrot.lane.b32.xlu1 %v2244_v48, %s2095_s5  ;;  %1757 = vmatprep.mubr.msk.f32.mxu1 %vm98_vm0, %v2244_v48  ;;  %v1863_v51 = vpack.c.bf16 %v468_v45, %v463_v49  ;;  %v2256_v52 = vpack.i.bf16 %v468_v45, %v463_v49 }
 0x2d9   :  { %1865 = vmatprep.subr.msk.bf16.mxu1 %vm2248_vm2, %v1863_v51 }
 0x2da   :  { %1868 = vmatpush3.bf16.xpose.msk.msra.mxu1 %vm2248_vm2, %v1863_v51 }
 0x2db   :  { %v1752_v54 = vpop.f32.mrb[4].mxu0 }
 0x2dc   :  { %v549_v55 = vadd.f32 %v1752_v54, %v1600_v53  ;;  %v543_v56 = vpop.f32.mrb[5].mxu0 }
 0x2dd   :  { %v544_v57 = vadd.f32 %v1600_v53, %v543_v56 }
 0x2df   :  { %v1869_v59 = vpack.c.bf16 %v549_v55, %v544_v57  ;;  %v2264_v60 = vpack.i.bf16 %v549_v55, %v544_v57 }
 0x2e1   :  { %1870 = vmatprep.subr.bf16.mxu0 %v1869_v59  ;;  %1758 = vmatmul.mubr.msk.f32.vlgmr.msra.gmra.mrb[4].mxu1 %vm98_vm0, %v2262_v58 }
 0x2e2   :  { %1872 = vmatpush3.bf16.msra.mxu0 %v1869_v59 }
 0x349   :  { %v752_v21 = vpop.permute.xlu1 %751 }
 0x3b4   :  { %v1759_v61 = vpop.f32.mrb[4].mxu1 }
 0x3b5   :  { %v632_v62 = vpop.f32.mrb[5].mxu1  ;;  %v642_v0 = vmul.f32 0.35355338, %v1759_v61 }
 0x3b6   :  { %v641_v1 = vmul.f32 0.35355338, %v632_v62 }
 0x3b7   :  { %v644_v5 = vadd.f32 %v642_v0, %v2276_v2 }
 0x3b8   :  { %v643_v3 = vadd.f32 %v641_v1, %v2271_v63 }
 0x3b9   :  { %v649_v6 = vsel %vm645_vm3, %v644_v5, -inf }
 0x3ba   :  { %v646_v4 = vsel %vm645_vm3, %v643_v3, -inf }
 0x3bb   :  { %647 = vmax.xlane.f32.xlu0 %v646_v4 }
 0x3bf   :  { %650 = vmax.xlane.f32.xlu0 %v649_v6 }
 0x3d5   :  { %1932 = vrot.lane.b32.xlu0 %v2256_v52, %s2095_s5 }
 0x448   :  { %v648_v7 = vpop.xlane.xlu0 %647 }
 0x449   :  { %v652_v8 = vsub.f32 %v643_v3, %v648_v7 }
 0x44b   :  { %v654_v11 = vmul.f32 1.442695, %v652_v8 }
 0x44c   :  { %v651_v9 = vpop.xlane.xlu0 %650 }
 0x44d   :  { %v653_v10 = vsub.f32 %v644_v5, %v651_v9 }
 0x44f   :  { %v656_v12 = vmul.f32 1.442695, %v653_v10 }
 0x450   :  { %v1933_v13 = vpop.permute.xlu0 %1932 }
 0x451   :  { %1961 = vpow2.f32 %v656_v12  ;;  %v1935_v14 = vunpack.i.h.bf16 %v1933_v13  ;;  %v1934_v15 = vunpack.i.l.bf16 %v1933_v13 }
 0x452   :  { %1963 = vpow2.f32 %v654_v11 }
 0x453   :  { %v1873_v16 = vpack.c.bf16 %v1935_v14, %v1934_v15 }
 0x455   :  { %1875 = vmatprep.subr.msk.bf16.mxu0 %vm2248_vm2, %v1873_v16 }
 0x45b   :  { %v1962_v17 = vpop.eup %1961 }
 0x45c   :  { %v661_v18 = vsel %vm645_vm3, %v1962_v17, 0.0  ;;  %v1964_v19 = vpop.eup %1963 }
 0x45d   :  { %662 = vadd.xlane.f32.xlu1 %v661_v18  ;;  %v658_v20 = vsel %vm645_vm3, %v1964_v19, 0.0 }
 0x461   :  { %659 = vadd.xlane.f32.xlu1 %v658_v20 }
 0x472   :  { %753 = vrot.lane.b32.xlu1 %v2262_v58, %s2095_s5 }
 0x4ea   :  { %v663_v22 = vpop.xlane.xlu1 %662 }
 0x4eb   :  { %1965 = vrcp.f32 %v663_v22 }
 0x4ee   :  { %v660_v23 = vpop.xlane.xlu1 %659 }
 0x4ef   :  { %1967 = vrcp.f32 %v660_v23 }
 0x4f2   :  { %v754_v28 = vpop.permute.xlu1 %753 }
 0x4f5   :  { %v1966_v24 = vpop.eup %1965 }
 0x4f6   :  { %v667_v27 = vmul.f32 %v1966_v24, %v1962_v17 }
 0x4f9   :  { %v1968_v25 = vpop.eup %1967 }
 0x4fa   :  { %v666_v26 = vmul.f32 %v1968_v25, %v1964_v19 }
 0x4fc   :  { %1764 = vmatprep.mubr.msk.f32.mxu0 %vm645_vm3, %v666_v26 }
 0x4fd   :  { %1765 = vmatmul.mubr.msk.f32.vlgmr.msra.gmra.mrb[6].mxu0 %vm645_vm3, %v667_v27 }
 0x4fe   :  { %1878 = vmatpush3.bf16.xpose.msk.msra.mxu0 %vm2248_vm2, %v1873_v16  ;;  %1771 = vmatprep.mubr.msk.f32.mxu0 %vm98_vm0, %v752_v21 }
 0x505   :  { %1772 = vmatmul.mubr.msk.f32.vlgmr.msra.gmra.mrb[8].mxu0 %vm98_vm0, %v754_v28 }
 0x5d0   :  { %v1766_v29 = vpop.f32.mrb[6].mxu0 }
 0x5d1   :  { %750 = vst.msk [vmem:[#allocation2 + $0x8] sm:$0xff] %vm98_vm0, %v1766_v29  ;;  %v740_v30 = vpop.f32.mrb[7].mxu0 }
 0x5d2   :  { %749 = vst.msk [vmem:[#allocation2] sm:$0xff] %vm98_vm0, %v740_v30 }
 0x5d8   :  { %v1773_v31 = vpop.f32.mrb[8].mxu0 }
 0x5d9   :  { %v843_v32 = vmul.f32 0.35355338, %v1773_v31  ;;  %v833_v33 = vpop.f32.mrb[9].mxu0 }
 0x5da   :  { %v842_v34 = vmul.f32 0.35355338, %v833_v33 }
 0x5db   :  { %v845_v35 = vadd.f32 %v843_v32, %v2276_v2 }
 0x5dc   :  { %v844_v36 = vadd.f32 %v842_v34, %v2271_v63 }
 0x5dd   :  { %v849_v37 = vsel %vm645_vm3, %v845_v35, -inf }
 0x5de   :  { %850 = vmax.xlane.f32.xlu0 %v849_v37  ;;  %v846_v38 = vsel %vm645_vm3, %v844_v36, -inf }
 0x5df   :  { %847 = vmax.xlane.f32.xlu1 %v846_v38 }
 0x5f0   :  { %1937 = vrot.lane.b32.xlu1 %v2264_v60, %s2095_s5 }
 0x5f4   :  { %968 = vrot.lane.b32.xlu1 %v2244_v48, %s2096_s1 }
 0x5f8   :  { %970 = vrot.lane.b32.xlu1 %v2262_v58, %s2096_s1 }
 0x66b   :  { %v851_v39 = vpop.xlane.xlu0 %850 }
 0x66c   :  { %v853_v40 = vsub.f32 %v845_v35, %v851_v39  ;;  %v848_v41 = vpop.xlane.xlu1 %847 }
 0x66d   :  { %v852_v42 = vsub.f32 %v844_v36, %v848_v41 }
 0x66e   :  { %v856_v43 = vmul.f32 1.442695, %v853_v40 }
 0x66f   :  { %v854_v44 = vmul.f32 1.442695, %v852_v42 }
 0x670   :  { %1969 = vpow2.f32 %v856_v43  ;;  %v1938_v45 = vpop.permute.xlu1 %1937 }
 0x671   :  { %v1940_v46 = vunpack.i.h.bf16 %v1938_v45  ;;  %v1939_v47 = vunpack.i.l.bf16 %v1938_v45  ;;  %1971 = vpow2.f32 %v854_v44 }
 0x673   :  { %v1879_v49 = vpack.c.bf16 %v1940_v46, %v1939_v47 }
 0x674   :  { %v969_v6 = vpop.permute.xlu1 %968 }
 0x675   :  { %1880 = vmatprep.subr.bf16.mxu1 %v1879_v49 }
 0x676   :  { %1882 = vmatpush3.bf16.msra.mxu1 %v1879_v49 }
 0x678   :  { %v971_v7 = vpop.permute.xlu1 %970 }
 0x67a   :  { %v1970_v51 = vpop.eup %1969 }
 0x67b   :  { %v861_v53 = vsel %vm645_vm3, %v1970_v51, 0.0  ;;  %v1972_v54 = vpop.eup %1971 }
 0x67c   :  { %862 = vadd.xlane.f32.xlu0 %v861_v53  ;;  %v858_v55 = vsel %vm645_vm3, %v1972_v54, 0.0 }
 0x680   :  { %859 = vadd.xlane.f32.xlu0 %v858_v55 }
 0x696   :  { %1942 = vrot.lane.b32.xlu0 %v2256_v52, %s2096_s1 }
 0x709   :  { %v863_v56 = vpop.xlane.xlu0 %862 }
 0x70a   :  { %1973 = vrcp.f32 %v863_v56 }
 0x70d   :  { %v860_v57 = vpop.xlane.xlu0 %859 }
 0x70e   :  { %1975 = vrcp.f32 %v860_v57 }
 0x711   :  { %v1943_v59 = vpop.permute.xlu0 %1942 }
 0x712   :  { %v1945_v61 = vunpack.i.h.bf16 %v1943_v59  ;;  %v1944_v62 = vunpack.i.l.bf16 %v1943_v59 }
 0x714   :  { %v1883_v0 = vpack.c.bf16 %v1945_v61, %v1944_v62  ;;  %v1974_v1 = vpop.eup %1973 }
 0x715   :  { %v867_v5 = vmul.f32 %v1974_v1, %v1970_v51 }
 0x716   :  { %1885 = vmatprep.subr.msk.bf16.mxu1 %vm2248_vm2, %v1883_v0 }
 0x718   :  { %v1976_v3 = vpop.eup %1975 }
 0x719   :  { %v866_v4 = vmul.f32 %v1976_v3, %v1972_v54 }
 0x71b   :  { %1778 = vmatprep.mubr.msk.f32.mxu1 %vm645_vm3, %v866_v4 }
 0x71c   :  { %1779 = vmatmul.mubr.msk.f32.vlgmr.msra.gmra.mrb[6].mxu1 %vm645_vm3, %v867_v5 }
 0x71d   :  { %1888 = vmatpush3.bf16.xpose.msk.msra.mxu1 %vm2248_vm2, %v1883_v0  ;;  %1785 = vmatprep.mubr.msk.f32.mxu1 %vm98_vm0, %v969_v6 }
 0x724   :  { %1786 = vmatmul.mubr.msk.f32.vlgmr.msra.gmra.mrb[8].mxu1 %vm98_vm0, %v971_v7 }
 0x7ef   :  { %v2320_v8 = vpop.f32.mrb[6].mxu1 }
 0x7f0   :  { %v2322_v9 = vpop.f32.mrb[7].mxu1 }
 0x7f7   :  { %v1787_v10 = vpop.f32.mrb[8].mxu1 }
 0x7f8   :  { %v1060_v11 = vmul.f32 0.35355338, %v1787_v10  ;;  %v1050_v12 = vpop.f32.mrb[9].mxu1 }
 0x7f9   :  { %v1059_v13 = vmul.f32 0.35355338, %v1050_v12 }
 0x7fa   :  { %v1062_v14 = vadd.f32 %v1060_v11, %v2276_v2 }
 0x7fb   :  { %v1061_v15 = vadd.f32 %v1059_v13, %v2271_v63 }
 0x7fc   :  { %v1066_v16 = vsel %vm645_vm3, %v1062_v14, -inf }
 0x7fd   :  { %1067 = vmax.xlane.f32.xlu0 %v1066_v16  ;;  %v1063_v17 = vsel %vm645_vm3, %v1061_v15, -inf  ;;  %v293_v16 = vld [vmem:[#allocation5 + $0x68] sm:$0xff] }
 0x7fe   :  { %1064 = vmax.xlane.f32.xlu1 %v1063_v17  ;;  %v294_v17 = vld [vmem:[#allocation5 + $0x70] sm:$0xff] }
 0x80f   :  { %1947 = vrot.lane.b32.xlu1 %v2264_v60, %s2096_s1 }
 0x813   :  { %1183 = vrot.lane.b32.xlu1 %v2244_v48, %s2097_s20 }
 0x817   :  { %1185 = vrot.lane.b32.xlu1 %v2262_v58, %s2097_s20 }
 0x88a   :  { %v1068_v18 = vpop.xlane.xlu0 %1067 }
 0x88b   :  { %v1070_v19 = vsub.f32 %v1062_v14, %v1068_v18  ;;  %v1065_v20 = vpop.xlane.xlu1 %1064  ;;  %v295_v18 = vld [vmem:[#allocation5 + $0x78] sm:$0xff] }
 0x88c   :  { %v1069_v21 = vsub.f32 %v1061_v15, %v1065_v20  ;;  %v292_v15 = vld [vmem:[#allocation5 + $0x60] sm:$0xff] }
 0x88d   :  { %v1073_v22 = vmul.f32 1.442695, %v1070_v19  ;;  %v1907_v19 = vpack.c.bf16 %v295_v18, %v294_v17  ;;  %v1487_v20 = vld [vmem:[#allocation8] sm:$0xff] }
 0x88e   :  { %v1071_v23 = vmul.f32 1.442695, %v1069_v21  ;;  %v1488_v21 = vld [vmem:[#allocation8 + $0x8] sm:$0xff] }
 0x88f   :  { %1977 = vpow2.f32 %v1073_v22  ;;  %v1948_v24 = vpop.permute.xlu1 %1947  ;;  %v1911_v22 = vpack.c.bf16 %v1488_v21, %v1487_v20 }
 0x890   :  { %v1950_v25 = vunpack.i.h.bf16 %v1948_v24  ;;  %v1949_v26 = vunpack.i.l.bf16 %v1948_v24  ;;  %1979 = vpow2.f32 %v1071_v23 }
 0x892   :  { %v1889_v27 = vpack.c.bf16 %v1950_v25, %v1949_v26 }
 0x893   :  { %v1184_v40 = vpop.permute.xlu1 %1183 }
 0x894   :  { %1890 = vmatprep.subr.bf16.mxu0 %v1889_v27 }
 0x895   :  { %1892 = vmatpush3.bf16.msra.mxu0 %v1889_v27 }
 0x899   :  { %v1978_v28 = vpop.eup %1977 }
 0x89a   :  { %v1078_v48 = vsel %vm645_vm3, %v1978_v28, 0.0  ;;  %v1980_v29 = vpop.eup %1979 }
 0x89b   :  { %1079 = vadd.xlane.f32.xlu0 %v1078_v48  ;;  %v1075_v58 = vsel %vm645_vm3, %v1980_v29, 0.0  ;;  %v1489_v48 = vld [vmem:[#allocation8 + $0x10] sm:$0xff] }
 0x89f   :  { %1076 = vadd.xlane.f32.xlu0 %v1075_v58 }
 0x8b5   :  { %1952 = vrot.lane.b32.xlu0 %v2256_v52, %s2097_s20  ;;  %v1186_v52 = vpop.permute.xlu1 %1185 }
 0x928   :  { %v1080_v30 = vpop.xlane.xlu0 %1079 }
 0x929   :  { %1981 = vrcp.f32 %v1080_v30  ;;  %v1627_v30 = vld [vmem:[#allocation7 + $0x3] ss:$0 sm:$0xff] }
 0x92c   :  { %v1077_v31 = vpop.xlane.xlu0 %1076 }
 0x92d   :  { %1983 = vrcp.f32 %v1077_v31 }
 0x930   :  { %v1953_v32 = vpop.permute.xlu0 %1952 }
 0x931   :  { %v1955_v33 = vunpack.i.h.bf16 %v1953_v32  ;;  %v1954_v34 = vunpack.i.l.bf16 %v1953_v32 }
 0x933   :  { %v1893_v35 = vpack.c.bf16 %v1955_v33, %v1954_v34  ;;  %v1982_v36 = vpop.eup %1981 }
 0x934   :  { %v1084_v39 = vmul.f32 %v1982_v36, %v1978_v28 }
 0x935   :  { %1895 = vmatprep.subr.msk.bf16.mxu0 %vm2248_vm2, %v1893_v35 }
 0x937   :  { %v1984_v37 = vpop.eup %1983 }
 0x938   :  { %v1083_v38 = vmul.f32 %v1984_v37, %v1980_v29  ;;  %v1490_v29 = vld [vmem:[#allocation8 + $0x18] sm:$0xff] }
 0x939   :  { %v1915_v58 = vpack.c.bf16 %v1490_v29, %v1489_v48 }
 0x93a   :  { %1792 = vmatprep.mubr.msk.f32.mxu0 %vm645_vm3, %v1083_v38 }
 0x93b   :  { %1793 = vmatmul.mubr.msk.f32.vlgmr.msra.gmra.mrb[10].mxu0 %vm645_vm3, %v1084_v39 }
 0x93c   :  { %1898 = vmatpush3.bf16.xpose.msk.msra.mxu0 %vm2248_vm2, %v1893_v35  ;;  %1799 = vmatprep.mubr.msk.f32.mxu0 %vm98_vm0, %v1184_v40  ;;  %v1630_v35 = vld [vmem:[%s2388_s9] ss:$0 sm:$0xff] }
 0x93d   :  { %1912 = vmatprep.subr.bf16.mxu0 %v1911_v22 }
 0x943   :  { %1800 = vmatmul.mubr.msk.f32.vlgmr.msra.gmra.mrb[12].mxu0 %vm98_vm0, %v1186_v52 }
 0x944   :  { %1914 = vmatpush3.bf16.msra.mxu0 %v1911_v22 }
 0x945   :  { %1916 = vmatprep.subr.bf16.mxu0 %v1915_v58 }
 0x948   :  { %1918 = vmatpush3.bf16.msra.mxu0 %v1915_v58 }
 0xa0e   :  { %v1794_v41 = vpop.f32.mrb[10].mxu0 }
 0xa0f   :  { %v1163_v42 = vpop.f32.mrb[11].mxu0 }
 0xa16   :  { %v1801_v43 = vpop.f32.mrb[12].mxu0 }
 0xa17   :  { %v1275_v44 = vmul.f32 0.35355338, %v1801_v43  ;;  %v1265_v45 = vpop.f32.mrb[13].mxu0 }
 0xa18   :  { %v1274_v46 = vmul.f32 0.35355338, %v1265_v45 }
 0xa19   :  { %v1277_v47 = vadd.f32 %v1275_v44, %v2276_v2 }
 0xa1a   :  { %v1276_v49 = vadd.f32 %v1274_v46, %v2271_v63 }
 0xa1b   :  { %v1281_v51 = vsel %vm645_vm3, %v1277_v47, -inf }
 0xa1c   :  { %1282 = vmax.xlane.f32.xlu0 %v1281_v51  ;;  %v1278_v50 = vsel %vm645_vm3, %v1276_v49, -inf }
 0xa1d   :  { %1279 = vmax.xlane.f32.xlu1 %v1278_v50 }
 0xa2e   :  { %1957 = vrot.lane.b32.xlu1 %v2264_v60, %s2097_s20 }
 0xa32   :  { %961 = vrot.lane.b32.xlu1 %v2320_v8, %s2089_s24 }
 0xa36   :  { %1174 = vrot.lane.b32.xlu1 %v1163_v42, %s2092_s2 }
 0xa3a   :  { %1176 = vrot.lane.b32.xlu1 %v1794_v41, %s2092_s2 }
 0xaa9   :  { %v1283_v53 = vpop.xlane.xlu0 %1282 }
 0xaaa   :  { %v1285_v2 = vsub.f32 %v1277_v47, %v1283_v53  ;;  %v1280_v54 = vpop.xlane.xlu1 %1279 }
 0xaab   :  { %v1284_v63 = vsub.f32 %v1276_v49, %v1280_v54 }
 0xaac   :  { %v1288_v55 = vmul.f32 1.442695, %v1285_v2 }
 0xaad   :  { %v1286_v56 = vmul.f32 1.442695, %v1284_v63 }
 0xaae   :  { %v1958_v57 = vpop.permute.xlu1 %1957 }
 0xaaf   :  { %1985 = vpow2.f32 %v1286_v56  ;;  %v1960_v59 = vunpack.i.h.bf16 %v1958_v57  ;;  %v1959_v61 = vunpack.i.l.bf16 %v1958_v57 }
 0xab0   :  { %1987 = vpow2.f32 %v1288_v55 }
 0xab1   :  { %v1899_v60 = vpack.c.bf16 %v1960_v59, %v1959_v61 }
 0xab2   :  { %v962_v62 = vpop.permute.xlu1 %961 }
 0xab3   :  { %967 = vst.msk [vmem:[#allocation2 + $0x8] sm:$0xff] %vm965_vm4, %v962_v62  ;;  %1900 = vmatprep.subr.bf16.mxu1 %v1899_v60 }
 0xab4   :  { %1902 = vmatpush3.bf16.msra.mxu1 %v1899_v60 }
 0xab6   :  { %v1175_v0 = vpop.permute.xlu1 %1174 }
 0xab9   :  { %v1986_v1 = vpop.eup %1985 }
 0xaba   :  { %v1177_v3 = vpop.permute.xlu1 %1176  ;;  %v1290_v4 = vsel %vm645_vm3, %v1986_v1, 0.0  ;;  %v1988_v5 = vpop.eup %1987 }
 0xabb   :  { %1182 = vst.msk [vmem:[#allocation2 + $0x8] sm:$0xff] %vm1180_vm5, %v1177_v3  ;;  %1291 = vadd.xlane.f32.xlu0 %v1290_v4  ;;  %v1293_v6 = vsel %vm645_vm3, %v1988_v5, 0.0 }
 0xabf   :  { %1294 = vadd.xlane.f32.xlu0 %v1293_v6 }
 0xad5   :  { %959 = vrot.lane.b32.xlu0 %v2322_v9, %s2089_s24  ;;  %v1903_v9 = vpack.c.bf16 %v293_v16, %v292_v15  ;;  %s2098_s24 = smov 24  }
 0xad7   :  { %1904 = vmatprep.subr.bf16.mxu1 %v1903_v9 }
 0xb48   :  { %v1292_v7 = vpop.xlane.xlu0 %1291 }
 0xb49   :  { %1989 = vrcp.f32 %v1292_v7 }
 0xb4c   :  { %v1295_v8 = vpop.xlane.xlu0 %1294 }
 0xb4d   :  { %1991 = vrcp.f32 %v1295_v8 }
 0xb50   :  { %v960_v10 = vpop.permute.xlu0 %959 }
 0xb51   :  { %966 = vst.msk [vmem:[#allocation2] sm:$0xff] %vm965_vm4, %v960_v10 }
 0xb52   :  { %1181 = vst.msk [vmem:[#allocation2] sm:$0xff] %vm1180_vm5, %v1175_v0 }
 0xb53   :  { %v1990_v11 = vpop.eup %1989 }
 0xb54   :  { %v1298_v12 = vmul.f32 %v1990_v11, %v1986_v1 }
 0xb56   :  { %1806 = vmatprep.mubr.msk.f32.mxu1 %vm645_vm3, %v1298_v12 }
 0xb57   :  { %v1992_v13 = vpop.eup %1991 }
 0xb58   :  { %v1299_v14 = vmul.f32 %v1992_v13, %v1988_v5 }
 0xb5a   :  { %1807 = vmatmul.mubr.msk.f32.vlgmr.msra.gmra.mrb[10].mxu1 %vm645_vm3, %v1299_v14 }
 0xb5b   :  { %1906 = vmatpush3.bf16.msra.mxu1 %v1903_v9 }
 0xb5c   :  { %1908 = vmatprep.subr.bf16.mxu1 %v1907_v19 }
 0xb5f   :  { %1910 = vmatpush3.bf16.msra.mxu1 %v1907_v19 }
 0xc2d   :  { %v1808_v23 = vpop.f32.mrb[10].mxu1 }
 0xc2e   :  { %1391 = vrot.lane.b32.xlu1 %v1808_v23, %s2098_s24  ;;  %v1378_v24 = vpop.f32.mrb[11].mxu1 }
 0xc2f   :  { %1389 = vrot.lane.b32.xlu0 %v1378_v24, %s2098_s24 }
 0xca0   :  { %v1392_v25 = vpop.permute.xlu1 %1391 }
 0xca1   :  { %1397 = vst.msk [vmem:[#allocation2 + $0x8] sm:$0xff] %vm1395_vm6, %v1392_v25  ;;  %v1390_v26 = vpop.permute.xlu0 %1389 }
 0xca2   :  { %1396 = vst.msk [vmem:[#allocation2] sm:$0xff] %vm1395_vm6, %v1390_v26 }
 0xca8   :  { %v1399_v28 = vld [vmem:[#allocation2 + $0x8] sm:$0xff] }
 0xca9   :  { %v1398_v27 = vld [vmem:[#allocation2] sm:$0xff] }
 0xcaa   :  { %1817 = vmatprep.mubr.msk.f32.mxu1 %vm193_vm1, %v1398_v27 }
 0xcab   :  { %1818 = vmatmul.mubr.msk.f32.vlgmr.msra.gmra.mrb[12].mxu1 %vm193_vm1, %v1399_v28 }
 0xd7e   :  { %v1819_v31 = vpop.f32.mrb[12].mxu1 }
 0xd7f   :  { %v1478_v32 = vpop.f32.mrb[13].mxu1  ;;  %v1484_v34 = vadd.f32 %v1819_v31, %v1627_v30 }
 0xd80   :  { %v1479_v33 = vadd.f32 %v1627_v30, %v1478_v32 }
 0xd82   :  { %1828 = vmatprep.mubr.msk.f32.mxu0 %vm193_vm1, %v1479_v33 }
 0xd83   :  { %1829 = vmatmul.mubr.msk.f32.vlgmr.msra.gmra.mrb[14].mxu0 %vm193_vm1, %v1484_v34 }
 0xe56   :  { %v1830_v36 = vpop.f32.mrb[14].mxu0 }
 0xe57   :  { %v1576_v37 = vadd.f32 %v1830_v36, %v1630_v35  ;;  %v1570_v38 = vpop.f32.mrb[15].mxu0 }
 0xe58   :  { %v1571_v39 = vadd.f32 %v1630_v35, %v1570_v38 }
 0xe59   :  { %1580 = vst [vmem:[%s2389_s10 + $0x8] sm:$0xff] %v1576_v37 }
 0xe5a   :  { %1579 = vst [vmem:[%s2389_s10] sm:$0xff] %v1571_v39 }
 0xe5b   :  { %1585 = vsyncpa [#allocation4], 1 }
 0xe5c   :  { %1586 = vsyncpa [#allocation6], 1 }
 0xe5d   :  { %1587 = vsyncpa [#allocation9], 1 }

</bundles_post_ra>
